<compile_context>
chip_gen: v7x
topology: tpu7x:2x2x1
jax: 0.10.0
libtpu: 0.0.40
codegen_flags: <defaults>
</compile_context>

<pallas_src>
import functools

import jax
import jax.numpy as jnp
from jax.experimental import pallas as pl
from jax.experimental.pallas import tpu as pltpu

EPS = 1e-5        # nn.BatchNorm2d default eps
NEG_SLOPE = 0.2   # nn.LeakyReLU(0.2)


def _conv_pool_stats_kernel(xw_ref, w4_ref, b_ref, pooled_ref, stats_ref, *,
                            n_valid):
    """Pass 1: 1x1 conv + 2x2 max-pool for one pixel tile, plus BN partials.

    xw_ref    : [4*Cin, Pt]     window-position-major rows, pixels on lanes
    w4_ref    : [4*Cout, 4*Cin] block-diagonal 1x1-conv weight
    b_ref     : [Cout, 1]       conv bias
    pooled_ref: [Cout, Pt]      conv+pool output tile
    stats_ref : [1, Cout, 2]    per-tile (sum, sum of squares) over valid pixels
    """
    cout, pt = pooled_ref.shape
    t = pl.program_id(0)

    # One MXU matmul covers all four 2x2 window positions at once.
    y = jnp.dot(w4_ref[...], xw_ref[...],
                preferred_element_type=jnp.float32)            # [4*Cout, Pt]

    # Max over the four window positions (static slices), then bias.
    pooled = jnp.maximum(
        jnp.maximum(y[0 * cout:1 * cout, :], y[1 * cout:2 * cout, :]),
        jnp.maximum(y[2 * cout:3 * cout, :], y[3 * cout:4 * cout, :]),
    ) + b_ref[...]                                             # [Cout, Pt]

    pooled_ref[...] = pooled

    # Single-pass BN partials; mask out padded columns so global stats are exact.
    col = t * pt + jax.lax.broadcasted_iota(jnp.int32, (cout, pt), 1)
    masked = jnp.where(col < n_valid, pooled, 0.0)
    stats_ref[0, :, 0:1] = jnp.sum(masked, axis=1, keepdims=True)
    stats_ref[0, :, 1:2] = jnp.sum(masked * masked, axis=1, keepdims=True)


def _bn_lrelu_kernel(pooled_ref, scale_ref, shift_ref, out_ref):
    """Pass 2: y = pooled*scale + shift (BN), then LeakyReLU(0.2)."""
    y = pooled_ref[...] * scale_ref[...] + shift_ref[...]
    out_ref[...] = jnp.where(y >= 0, y, NEG_SLOPE * y)


def basic_block_au(x_nchw, w, b, gamma, beta, *, p_tile=2048,
                   compute_dtype=jnp.float32):
    """x_nchw: [N, Cin, H, W]; w: [Cout, Cin] (1x1 conv weight);
    b/gamma/beta: [Cout].  Returns [N, Cout, H//2, W//2] (train-mode BN)."""
    N, Cin, H, W = x_nchw.shape
    Cout = w.shape[0]
    Hh, Wh = H // 2, W // 2
    P = N * Hh * Wh

    # Pixel-tile size: multiple of 128 lanes, capped so double-buffered tiles
    # stay far below the scoped VMEM limit on every generation (incl. v7x).
    pt = max(128, min(int(p_tile), 2048))
    pt = ((pt + 127) // 128) * 128
    pt = min(pt, ((P + 127) // 128) * 128)
    n_tiles = (P + pt - 1) // pt
    p_pad = n_tiles * pt

    # Layout: NCHW -> [4*Cin, P]; rows = (window position k, channel c).
    xr = x_nchw.reshape(N, Cin, Hh, 2, Wh, 2)
    xw = jnp.transpose(xr, (3, 5, 1, 0, 2, 4)).reshape(4 * Cin, P)
    xw = xw.astype(compute_dtype)
    if p_pad > P:
        xw = jnp.pad(xw, ((0, 0), (0, p_pad - P)))

    # Block-diagonal weight so all four window positions share one MXU dot.
    w2 = w.reshape(Cout, Cin).astype(compute_dtype)
    w4 = jnp.kron(jnp.eye(4, dtype=w2.dtype), w2)              # [4*Cout, 4*Cin]
    b2 = b.reshape(Cout, 1).astype(jnp.float32)

    par = pltpu.CompilerParams(dimension_semantics=("parallel",))

    # ---- pass 1: conv + max-pool + per-tile BN partial sums ----
    pooled, stats = pl.pallas_call(
        functools.partial(_conv_pool_stats_kernel, n_valid=P),
        grid=(n_tiles,),
        in_specs=[
            pl.BlockSpec((4 * Cin, pt), lambda t: (0, t)),
            pl.BlockSpec((4 * Cout, 4 * Cin), lambda t: (0, 0)),
            pl.BlockSpec((Cout, 1), lambda t: (0, 0)),
        ],
        out_specs=(
            pl.BlockSpec((Cout, pt), lambda t: (0, t)),
            pl.BlockSpec((1, Cout, 2), lambda t: (t, 0, 0)),
        ),
        out_shape=(
            jax.ShapeDtypeStruct((Cout, p_pad), jnp.float32),
            jax.ShapeDtypeStruct((n_tiles, Cout, 2), jnp.float32),
        ),
        compiler_params=par,
    )(xw, w4, b2)

    # ---- tiny parameter-sized glue: global stats -> per-channel scale/shift ----
    s = jnp.sum(stats[:, :, 0], axis=0)                        # [Cout]
    sq = jnp.sum(stats[:, :, 1], axis=0)                       # [Cout]
    mean = s / P
    var = jnp.maximum(sq / P - mean * mean, 0.0)               # biased (train-mode)
    scale = gamma * jax.lax.rsqrt(var + EPS)
    shift = beta - mean * scale

    # ---- pass 2: normalize + LeakyReLU ----
    out2d = pl.pallas_call(
        _bn_lrelu_kernel,
        grid=(n_tiles,),
        in_specs=[
            pl.BlockSpec((Cout, pt), lambda t: (0, t)),
            pl.BlockSpec((Cout, 1), lambda t: (0, 0)),
            pl.BlockSpec((Cout, 1), lambda t: (0, 0)),
        ],
        out_specs=pl.BlockSpec((Cout, pt), lambda t: (0, t)),
        out_shape=jax.ShapeDtypeStruct((Cout, p_pad), jnp.float32),
        compiler_params=par,
    )(pooled,
      scale.reshape(Cout, 1).astype(jnp.float32),
      shift.reshape(Cout, 1).astype(jnp.float32))

    out = out2d[:, :P].reshape(Cout, N, Hh, Wh)
    return jnp.transpose(out, (1, 0, 2, 3))                    # back to NCHW


def _reference(x_nchw, w, b, gamma, beta):
    """Pure-JAX reference mirroring the PyTorch forward (train-mode BN)."""
    y = jnp.einsum("nchw,oc->nohw", x_nchw, w) + b[None, :, None, None]
    N, C, H, W = y.shape
    y = y.reshape(N, C, H // 2, 2, W // 2, 2).max(axis=(3, 5))
    mean = y.mean(axis=(0, 2, 3), keepdims=True)
    var = ((y - mean) ** 2).mean(axis=(0, 2, 3), keepdims=True)
    y = gamma[None, :, None, None] * (y - mean) * jax.lax.rsqrt(var + EPS) \
        + beta[None, :, None, None]
    return jnp.where(y >= 0, y, NEG_SLOPE * y)


if __name__ == "__main__":
    key = jax.random.PRNGKey(0)
    k_x, k_w, k_b, k_g, k_bt, k_x2 = jax.random.split(key, 6)

    # Shapes implied by BasicBlock_AU(in_planes=4, out_planes=8) on NCHW input.
    N, Cin, H, W = 2, 4, 16, 16
    Cout = 8

    x = jax.random.normal(k_x, (N, Cin, H, W), dtype=jnp.float32)
    w = jax.random.normal(k_w, (Cout, Cin), dtype=jnp.float32) * 0.1
    b = jax.random.normal(k_b, (Cout,), dtype=jnp.float32) * 0.1
    gamma = 1.0 + 0.1 * jax.random.normal(k_g, (Cout,), dtype=jnp.float32)
    beta = 0.1 * jax.random.normal(k_bt, (Cout,), dtype=jnp.float32)

    out = jax.block_until_ready(basic_block_au(x, w, b, gamma, beta))
    ref = _reference(x, w, b, gamma, beta)
    assert out.shape == (N, Cout, H // 2, W // 2)
    assert jnp.allclose(out, ref, atol=1e-4, rtol=1e-4), \
        float(jnp.max(jnp.abs(out - ref)))

    # Second check exercising a multi-tile grid + padded-pixel masking
    # (P = 3*8*8 = 192 pixels, tile = 128 -> 2 tiles, 64 padded columns).
    x2 = jax.random.normal(k_x2, (3, Cin, H, W), dtype=jnp.float32)
    out2 = jax.block_until_ready(
        basic_block_au(x2, w, b, gamma, beta, p_tile=128))
    ref2 = _reference(x2, w, b, gamma, beta)
    assert out2.shape == (3, Cout, H // 2, W // 2)
    assert jnp.allclose(out2, ref2, atol=1e-4, rtol=1e-4), \
        float(jnp.max(jnp.abs(out2 - ref2)))

    print("KERNEL_OK")
</pallas_src>

<mosaic_0001>
module attributes {stable_mosaic.version = 11 : i64} {
  func.func @_conv_pool_stats_kernel(%arg0: i32, %arg1: memref<16x128xf32, #tpu.memory_space<vmem>>, %arg2: memref<32x16xf32, #tpu.memory_space<vmem>>, %arg3: memref<8x1xf32, #tpu.memory_space<vmem>>, %arg4: memref<8x128xf32, #tpu.memory_space<vmem>>, %arg5: memref<1x8x2xf32, #tpu.memory_space<vmem>>) attributes {dimension_semantics = [#tpu.dimension_semantics<parallel>], iteration_bounds = array<i64: 1>, scalar_prefetch = 0 : i64, scratch_operands = 0 : i64, tpu.core_type = #tpu.core_type<tc>, window_params = [{transform_indices = @transform_0, window_bounds = array<i64: 16, 128>}, {pipeline_mode = #tpu.pipeline_mode<synchronous>, transform_indices = @transform_1, window_bounds = array<i64: 32, 16>}, {pipeline_mode = #tpu.pipeline_mode<synchronous>, transform_indices = @transform_2, window_bounds = array<i64: 8, 1>}, {transform_indices = @transform_3, window_bounds = array<i64: 8, 128>}, {transform_indices = @transform_4, window_bounds = array<i64: 1, 8, 2>}]} {
    %c0 = arith.constant 0 : index
    %c0_0 = arith.constant 0 : index
    %0 = vector.load %arg2[%c0, %c0_0] : memref<32x16xf32, #tpu.memory_space<vmem>>, vector<32x16xf32>
    %c0_1 = arith.constant 0 : index
    %c0_2 = arith.constant 0 : index
    %1 = vector.load %arg1[%c0_1, %c0_2] : memref<16x128xf32, #tpu.memory_space<vmem>>, vector<16x128xf32>
    %cst = arith.constant dense<0.000000e+00> : vector<32x128xf32>
    %2 = tpu.matmul %0, %1, %cst {dimension_numbers = #tpu.dot_dimension_numbers<[1], [0], [0], [1], [0, 0, 1, 1], [], []>} : vector<32x16xf32>, vector<16x128xf32>, vector<32x128xf32> -> vector<32x128xf32>
    %3 = vector.extract_strided_slice %2 {offsets = [0, 0], sizes = [8, 128], strides = [1, 1]} : vector<32x128xf32> to vector<8x128xf32>
    %4 = vector.extract_strided_slice %2 {offsets = [8, 0], sizes = [8, 128], strides = [1, 1]} : vector<32x128xf32> to vector<8x128xf32>
    %5 = arith.maximumf %3, %4 : vector<8x128xf32>
    %6 = vector.extract_strided_slice %2 {offsets = [16, 0], sizes = [8, 128], strides = [1, 1]} : vector<32x128xf32> to vector<8x128xf32>
    %7 = vector.extract_strided_slice %2 {offsets = [24, 0], sizes = [8, 128], strides = [1, 1]} : vector<32x128xf32> to vector<8x128xf32>
    %8 = arith.maximumf %6, %7 : vector<8x128xf32>
    %9 = arith.maximumf %5, %8 : vector<8x128xf32>
    %c0_3 = arith.constant 0 : index
    %c0_4 = arith.constant 0 : index
    %10 = vector.load %arg3[%c0_3, %c0_4] : memref<8x1xf32, #tpu.memory_space<vmem>>, vector<8x1xf32>
    %11 = vector.broadcast %10 : vector<8x1xf32> to vector<8x128xf32>
    %12 = arith.addf %9, %11 : vector<8x128xf32>
    %c0_5 = arith.constant 0 : index
    %c0_6 = arith.constant 0 : index
    %13 = vector.load %arg4[%c0_5, %c0_6] : memref<8x128xf32, #tpu.memory_space<vmem>>, vector<8x128xf32>
    tpu.vector_store %arg4[%c0_5, %c0_6], %12 {strides = array<i32>} : memref<8x128xf32, #tpu.memory_space<vmem>>, vector<8x128xf32>,
    %c128_i32 = arith.constant 128 : i32
    %14 = arith.muli %arg0, %c128_i32 : i32
    %15 = tpu.iota {dimensions = array<i32: 1>} : vector<8x128xi32>
    %16 = vector.broadcast %14 : i32 to vector<8x128xi32>
    %17 = arith.addi %16, %15 : vector<8x128xi32>
    %c128_i32_7 = arith.constant 128 : i32
    %18 = vector.broadcast %c128_i32_7 : i32 to vector<8x128xi32>
    %19 = arith.cmpi slt, %17, %18 : vector<8x128xi32>
    %cst_8 = arith.constant 0.000000e+00 : f32
    %20 = vector.broadcast %cst_8 : f32 to vector<8x128xf32>
    %21 = arith.select %19, %12, %20 : vector<8x128xi1>, vector<8x128xf32>
    %cst_9 = arith.constant dense<0.000000e+00> : vector<8xf32>
    %22 = vector.multi_reduction <add>, %21, %cst_9 [1] : vector<8x128xf32> to vector<8xf32>
    %23 = vector.shape_cast %22 : vector<8xf32> to vector<8x1xf32>
    %c0_10 = arith.constant 0 : index
    %c0_11 = arith.constant 0 : index
    %c0_12 = arith.constant 0 : index
    %24 = vector.load %arg5[%c0_10, %c0_11, %c0_12] : memref<1x8x2xf32, #tpu.memory_space<vmem>>, vector<1x8x1xf32>
    %25 = vector.shape_cast %24 : vector<1x8x1xf32> to vector<8x1xf32>
    %26 = vector.shape_cast %23 : vector<8x1xf32> to vector<1x8x1xf32>
    tpu.vector_store %arg5[%c0_10, %c0_11, %c0_12], %26 {strides = array<i32>} : memref<1x8x2xf32, #tpu.memory_space<vmem>>, vector<1x8x1xf32>,
    %27 = arith.mulf %21, %21 : vector<8x128xf32>
    %cst_13 = arith.constant dense<0.000000e+00> : vector<8xf32>
    %28 = vector.multi_reduction <add>, %27, %cst_13 [1] : vector<8x128xf32> to vector<8xf32>
    %29 = vector.shape_cast %28 : vector<8xf32> to vector<8x1xf32>
    %c0_14 = arith.constant 0 : index
    %c0_15 = arith.constant 0 : index
    %c1 = arith.constant 1 : index
    %30 = vector.load %arg5[%c0_14, %c0_15, %c1] : memref<1x8x2xf32, #tpu.memory_space<vmem>>, vector<1x8x1xf32>
    %31 = vector.shape_cast %30 : vector<1x8x1xf32> to vector<8x1xf32>
    %32 = vector.shape_cast %29 : vector<8x1xf32> to vector<1x8x1xf32>
    tpu.vector_store %arg5[%c0_14, %c0_15, %c1], %32 {strides = array<i32>} : memref<1x8x2xf32, #tpu.memory_space<vmem>>, vector<1x8x1xf32>,
    return
  }
  func.func @transform_0(%arg0: i32) -> (i32, i32) {
    %c0_i32 = arith.constant 0 : i32
    %c0_i32_0 = arith.constant 0 : i32
    return %c0_i32, %arg0 : i32, i32
  }
  func.func @transform_1(%arg0: i32) -> (i32, i32) {
    %c0_i32 = arith.constant 0 : i32
    %c0_i32_0 = arith.constant 0 : i32
    %c0_i32_1 = arith.constant 0 : i32
    return %c0_i32, %c0_i32_0 : i32, i32
  }
  func.func @transform_2(%arg0: i32) -> (i32, i32) {
    %c0_i32 = arith.constant 0 : i32
    %c0_i32_0 = arith.constant 0 : i32
    %c0_i32_1 = arith.constant 0 : i32
    return %c0_i32, %c0_i32_0 : i32, i32
  }
  func.func @transform_3(%arg0: i32) -> (i32, i32) {
    %c0_i32 = arith.constant 0 : i32
    %c0_i32_0 = arith.constant 0 : i32
    return %c0_i32, %arg0 : i32, i32
  }
  func.func @transform_4(%arg0: i32) -> (i32, i32, i32) {
    %c0_i32 = arith.constant 0 : i32
    %c0_i32_0 = arith.constant 0 : i32
    %c0_i32_1 = arith.constant 0 : i32
    return %arg0, %c0_i32, %c0_i32_0 : i32, i32, i32
  }
}

</mosaic_0001>

<bundles_post_ra>
// kernel: tpu_custom_call.1
= control target key start
LH: loop header
LB: loop body
LE: loop exit
PB: predicated region body
PF: predicated region fallthrough
CT: control target
= control target key end

     0   :  { %vm23_vm0 = vcmask 130048   ;;  %v219_v5 = vmov 0   ;;  %s289_s0 = inlined_call_operand.vmem [shape: f32[16,128], index: 0, kind: input, shape index: {}]   ;;  %s290_s1 = inlined_call_operand.vmem [shape: f32[32,16], index: 1, kind: input, shape index: {}]   ;;  %s291_s2 = inlined_call_operand.vmem [shape: f32[8,1], index: 2, kind: input, shape index: {}]   ;;  %s292_s3 = inlined_call_operand.hbm [shape: f32[8,128], index: 3, kind: output, shape index: {0}]   ;;  %s293_s4 = inlined_call_operand.vmem [shape: f32[1,8,2], index: 4, kind: output, shape index: {1}]  }
   0x1   :  { %v21_v0 = vld [vmem:[%s289_s0] sm:$0xff]  ;;  %v22_v1 = vld [vmem:[%s289_s0 + $0x8] sm:$0xff]  ;;  %v19_v4 = vld [vmem:[%s290_s1 + $0x10] sm:$0xff]  ;;  %194 = vset.pattern.permute.xlu0 %v219_v5 }
   0x2   :  { %v17_v2 = vld [vmem:[%s290_s1] sm:$0xff]  ;;  %v186_v3 = vpack.c.bf16 %v22_v1, %v21_v0  ;;  %183 = vmatprep.mubr.msk.f32.mxu1 %vm23_vm0, %v19_v4 }
   0x3   :  { %180 = vmatprep.mubr.msk.f32.mxu0 %vm23_vm0, %v17_v2  ;;  %v124_v6 = vld [vmem:[%s291_s2] sm:$0xff] }
   0x4   :  { %10 = vsyncpa [#allocation3], 0  ;;  %187 = vmatprep.subr.bf16.mxu0 %v186_v3  ;;  %190 = vmatprep.subr.bf16.mxu1 %v186_v3  ;;  %v18_v7 = vld [vmem:[%s290_s1 + $0x8] sm:$0xff]  ;;  %v20_v8 = vld [vmem:[%s290_s1 + $0x18] sm:$0xff]  ;;  %s220_s2 = smov [#allocation2]  }
   0x5   :  { %189 = vmatpush3.bf16.msra.mxu0 %v186_v3  ;;  %191 = vmatpush3.bf16.msra.mxu1 %v186_v3  ;;  %s154_s1 = sshll.u32 %s220_s2, 4  ;;  %s155_s1 = int_to_ptr.vmem [resolvable:$true] %s154_s1 }
   0x6   :  { %127 = vperm.xlu0 %194, %v124_v6   ;;  %s195_s28 = scalar_lea.vmem %s155_s1, 128  ;;  %p200_p1 = scmp.lt.s32.totalorder %s155_s1, %s155_s1 }
   0x7   :  { %p196_p0 = scmp.ne.s32.totalorder %s155_s1, %s195_s28  ;;  %p201_p2 = scmp.lt.s32.totalorder %s195_s28, %s195_s28 }
   0x8   :  { %181 = vmatmul.mubr.msk.f32.vlgmr.msra.gmra.mrb[0].mxu0 %vm23_vm0, %v18_v7  ;;  %184 = vmatmul.mubr.msk.f32.vlgmr.msra.gmra.mrb[0].mxu1 %vm23_vm0, %v20_v8 }
   0x9   :  { %p202_p3 = por %p201_p2, %p200_p1 }
   0xb   :  { %p203_p4 = pnand %p202_p3, %p196_p0 }
  0x85   :  { %v128_v15 = vpop.permute.xlu0 %127 }
  0xdb   :  { %v182_v9 = vpop.f32.mrb[0].mxu0  ;;  %v185_v10 = vpop.f32.mrb[0].mxu1 }
  0xdc   :  { %v102_v11 = vpop.f32.mrb[1].mxu0  ;;  %v112_v12 = vpop.f32.mrb[1].mxu1 }
  0xdd   :  { %v121_v13 = vmax.f32 %v102_v11, %v182_v9  ;;  %v122_v14 = vmax.f32 %v112_v12, %v185_v10 }
  0xdf   :  { %v123_v16 = vmax.f32 %v121_v13, %v122_v14 }
  0xe1   :  { %v130_v17 = vadd.f32 %v128_v15, %v123_v16 }
  0xe3   :  { %131 = vst [vmem:[#allocation2] sm:$0xff] %v130_v17  ;;  %139 = vadd.xlane.f32.xlu0 %v130_v17  ;;  %v143_v18 = vmul.f32 %v130_v17, %v130_v17 }
  0xe5   :  { %144 = vadd.xlane.f32.xlu1 %v143_v18 }
  0xe6   :  { %206 = shalt.err (!%p203_p4)
}
  0xe7   :  { %s207_s5 = scalar_lea.hbm %s292_s3, 128 }
  0xe8   :  { %p208_p5 = scmp.ne.s32.totalorder %s292_s3, %s207_s5  ;;  %p211_p6 = scmp.lt.u32.totalorder %s207_s5, %s292_s3 }
  0xea   :  { %p213_p7 = pnand %p211_p6, %p208_p5 }
  0xec   :  { %216 = shalt.err (!%p213_p7)
}
  0xed   :  { %157 = dma.vmem_to_hbm [thread:$0]  %s155_s1, 128, %s292_s3, [#allocation3]   ;;  %vm141_vm1 = vcmask 7168   ;;  %vm146_vm2 = vcmask 15368  }
 0x170   :  { %v140_v19 = vpop.xlane.xlu0 %139 }
 0x171   :  { %142 = vst.msk [vmem:[%s293_s4] sm:$0xff] %vm141_vm1, %v140_v19 }
 0x172   :  { %v145_v20 = vpop.xlane.xlu1 %144 }
 0x173   :  { %147 = vst.msk [vmem:[%s293_s4] sm:$0xff] %vm146_vm2, %v145_v20 }
 0x174   :  { %217 = dma.done.wait [#allocation3], 128  }
 0x175   :  { %218 = vsyncadd [#allocation3], 4294967168 }
 0x176   :  { %165 = vsyncpa [#allocation3], 1 }

</bundles_post_ra>
